<compile_context>
chip_gen: v5e
topology: v5e:2x2
jax: 0.10.0
libtpu: 0.0.40
codegen_flags: <defaults>
</compile_context>

<pallas_src>
import functools

import jax
import jax.numpy as jnp
from jax.experimental import pallas as pl
from jax.experimental.pallas import tpu as pltpu

INPUT_SIZE = 4
HIDDEN_SIZE = 128
OUTPUT_SIZE = 12
OUTPUT_PAD = 128          # lane-dense padded output width (multiple of 128)
TB_MAX = 512              # max batch tile (rows); safe for v7x's smaller VMEM


def _round_up(n, m):
    return ((n + m - 1) // m) * m


def _mlp_kernel(x_ref, w1_ref, b1_ref, w2_ref, b2_ref, o_ref):
    x = x_ref[...]                       # (TB, INPUT_SIZE) f32
    w1 = w1_ref[...]                     # (INPUT_SIZE, HIDDEN_SIZE)

    # fc1: K=4 contraction -> 4 unrolled VPU broadcast-multiply-adds (MXU would
    # pay full push/pop latency for a 4-deep pass). Bias is folded into the init.
    h = jnp.broadcast_to(b1_ref[...], (x.shape[0], HIDDEN_SIZE))
    for k in range(INPUT_SIZE):          # static unroll, INPUT_SIZE == 4
        h = h + x[:, k:k + 1] * w1[k:k + 1, :]

    # ReLU
    h = jnp.maximum(h, 0.0)

    # fc2: (TB, 128) @ (128, 128 padded) on the MXU, f32 accumulation.
    y = jnp.dot(h, w2_ref[...], preferred_element_type=jnp.float32)
    y = y + b2_ref[...]

    o_ref[...] = y.astype(o_ref.dtype)


@functools.partial(jax.jit, static_argnames=("tb",))
def neural_network_forward(x, w1, b1, w2, b2, *, tb=None):
    """Pallas implementation of NeuralNetwork.forward.

    x:  (B, INPUT_SIZE)              float32
    w1: (INPUT_SIZE, HIDDEN_SIZE)    (transposed from PyTorch's (out, in) layout)
    b1: (1, HIDDEN_SIZE)
    w2: (HIDDEN_SIZE, OUTPUT_SIZE)
    b2: (1, OUTPUT_SIZE)
    returns (B, OUTPUT_SIZE) float32
    """
    B = x.shape[0]

    # Batch tile: multiple of 8 sublanes, capped at TB_MAX.
    if tb is None:
        tb = min(TB_MAX, _round_up(B, 8))
    tb = max(8, _round_up(tb, 8))

    b_pad = _round_up(B, tb)
    if b_pad != B:
        x = jnp.pad(x, ((0, b_pad - B), (0, 0)))

    # Zero-pad fc2 weight/bias out to a lane-dense 128-wide output.
    w2p = jnp.zeros((HIDDEN_SIZE, OUTPUT_PAD), jnp.float32).at[:, :OUTPUT_SIZE].set(w2)
    b2p = jnp.zeros((1, OUTPUT_PAD), jnp.float32).at[:, :OUTPUT_SIZE].set(b2)

    grid = (b_pad // tb,)

    cost = pl.CostEstimate(
        flops=2 * b_pad * (INPUT_SIZE * HIDDEN_SIZE + HIDDEN_SIZE * OUTPUT_PAD),
        transcendentals=0,
        bytes_accessed=(
            b_pad * (INPUT_SIZE + OUTPUT_PAD) * 4
            + (INPUT_SIZE * HIDDEN_SIZE + HIDDEN_SIZE + HIDDEN_SIZE * OUTPUT_PAD + OUTPUT_PAD) * 4
        ),
    )

    out = pl.pallas_call(
        _mlp_kernel,
        out_shape=jax.ShapeDtypeStruct((b_pad, OUTPUT_PAD), jnp.float32),
        grid=grid,
        in_specs=[
            # x: tiled over batch (pipelined / double-buffered).
            pl.BlockSpec((tb, INPUT_SIZE), lambda i: (i, 0)),
            # weights & biases: constant index map -> VMEM-resident across steps.
            pl.BlockSpec((INPUT_SIZE, HIDDEN_SIZE), lambda i: (0, 0)),
            pl.BlockSpec((1, HIDDEN_SIZE), lambda i: (0, 0)),
            pl.BlockSpec((HIDDEN_SIZE, OUTPUT_PAD), lambda i: (0, 0)),
            pl.BlockSpec((1, OUTPUT_PAD), lambda i: (0, 0)),
        ],
        out_specs=pl.BlockSpec((tb, OUTPUT_PAD), lambda i: (i, 0)),
        compiler_params=pltpu.CompilerParams(
            dimension_semantics=("parallel",),
        ),
        cost_estimate=cost,
    )(x, w1, b1, w2p, b2p)

    # Slice back to the true batch and the 12 real output columns.
    return out[:B, :OUTPUT_SIZE]


def init_params(key):
    """Deterministic init mimicking nn.Linear (uniform(-1/sqrt(fan_in), 1/sqrt(fan_in)))."""
    k1, k2, k3, k4 = jax.random.split(key, 4)
    bound1 = 1.0 / jnp.sqrt(INPUT_SIZE)
    bound2 = 1.0 / jnp.sqrt(HIDDEN_SIZE)
    # Stored directly in (in, out) layout = transpose of PyTorch's (out, in).
    w1 = jax.random.uniform(k1, (INPUT_SIZE, HIDDEN_SIZE), jnp.float32, -bound1, bound1)
    b1 = jax.random.uniform(k2, (1, HIDDEN_SIZE), jnp.float32, -bound1, bound1)
    w2 = jax.random.uniform(k3, (HIDDEN_SIZE, OUTPUT_SIZE), jnp.float32, -bound2, bound2)
    b2 = jax.random.uniform(k4, (1, OUTPUT_SIZE), jnp.float32, -bound2, bound2)
    return w1, b1, w2, b2


if __name__ == "__main__":
    key = jax.random.PRNGKey(0)
    k_x, k_p = jax.random.split(key)

    w1, b1, w2, b2 = init_params(k_p)

    def ref_fn(x):
        return jnp.maximum(x @ w1 + b1, 0.0) @ w2 + b2

    # Small batch, multi-step grid (tb=8 -> grid of 3) to exercise tiling.
    batch = 24
    x = jax.random.normal(k_x, (batch, INPUT_SIZE), dtype=jnp.float32)
    out = jax.block_until_ready(neural_network_forward(x, w1, b1, w2, b2, tb=8))
    assert out.shape == (batch, OUTPUT_SIZE)
    assert jnp.allclose(out, ref_fn(x), atol=1e-5, rtol=1e-5)

    # Default tiling path (single tile, padded batch) on a non-multiple-of-8 batch.
    batch2 = 10
    x2 = jax.random.normal(k_x, (batch2, INPUT_SIZE), dtype=jnp.float32)
    out2 = jax.block_until_ready(neural_network_forward(x2, w1, b1, w2, b2))
    assert out2.shape == (batch2, OUTPUT_SIZE)
    assert jnp.allclose(out2, ref_fn(x2), atol=1e-5, rtol=1e-5)

    print("KERNEL_OK")
</pallas_src>

<mosaic_0001>
module attributes {stable_mosaic.version = 11 : i64} {
  func.func @_mlp_kernel(%arg0: i32, %arg1: memref<8x4xf32, #tpu.memory_space<vmem>>, %arg2: memref<4x128xf32, #tpu.memory_space<vmem>>, %arg3: memref<1x128xf32, #tpu.memory_space<vmem>>, %arg4: memref<128x128xf32, #tpu.memory_space<vmem>>, %arg5: memref<1x128xf32, #tpu.memory_space<vmem>>, %arg6: memref<8x128xf32, #tpu.memory_space<vmem>>) attributes {dimension_semantics = [#tpu.dimension_semantics<parallel>], iteration_bounds = array<i64: 3>, scalar_prefetch = 0 : i64, scratch_operands = 0 : i64, tpu.core_type = #tpu.core_type<tc>, window_params = [{transform_indices = @transform_0, window_bounds = array<i64: 8, 4>}, {pipeline_mode = #tpu.pipeline_mode<synchronous>, transform_indices = @transform_1, window_bounds = array<i64: 4, 128>}, {pipeline_mode = #tpu.pipeline_mode<synchronous>, transform_indices = @transform_2, window_bounds = array<i64: 1, 128>}, {pipeline_mode = #tpu.pipeline_mode<synchronous>, transform_indices = @transform_3, window_bounds = array<i64: 128, 128>}, {pipeline_mode = #tpu.pipeline_mode<synchronous>, transform_indices = @transform_4, window_bounds = array<i64: 1, 128>}, {transform_indices = @transform_5, window_bounds = array<i64: 8, 128>}]} {
    %c0 = arith.constant 0 : index
    %c0_0 = arith.constant 0 : index
    %0 = vector.load %arg1[%c0, %c0_0] : memref<8x4xf32, #tpu.memory_space<vmem>>, vector<8x4xf32>
    %c0_1 = arith.constant 0 : index
    %c0_2 = arith.constant 0 : index
    %1 = vector.load %arg2[%c0_1, %c0_2] : memref<4x128xf32, #tpu.memory_space<vmem>>, vector<4x128xf32>
    %c0_3 = arith.constant 0 : index
    %c0_4 = arith.constant 0 : index
    %2 = vector.load %arg3[%c0_3, %c0_4] : memref<1x128xf32, #tpu.memory_space<vmem>>, vector<1x128xf32>
    %3 = vector.shape_cast %2 : vector<1x128xf32> to vector<1x128xf32>
    %4 = vector.broadcast %3 : vector<1x128xf32> to vector<8x128xf32>
    %5 = vector.extract_strided_slice %0 {offsets = [0, 0], sizes = [8, 1], strides = [1, 1]} : vector<8x4xf32> to vector<8x1xf32>
    %6 = vector.extract_strided_slice %1 {offsets = [0, 0], sizes = [1, 128], strides = [1, 1]} : vector<4x128xf32> to vector<1x128xf32>
    %7 = vector.broadcast %5 : vector<8x1xf32> to vector<8x128xf32>
    %8 = vector.broadcast %6 : vector<1x128xf32> to vector<8x128xf32>
    %9 = arith.mulf %7, %8 : vector<8x128xf32>
    %10 = arith.addf %4, %9 : vector<8x128xf32>
    %11 = vector.extract_strided_slice %0 {offsets = [0, 1], sizes = [8, 1], strides = [1, 1]} : vector<8x4xf32> to vector<8x1xf32>
    %12 = vector.extract_strided_slice %1 {offsets = [1, 0], sizes = [1, 128], strides = [1, 1]} : vector<4x128xf32> to vector<1x128xf32>
    %13 = vector.broadcast %11 : vector<8x1xf32> to vector<8x128xf32>
    %14 = vector.broadcast %12 : vector<1x128xf32> to vector<8x128xf32>
    %15 = arith.mulf %13, %14 : vector<8x128xf32>
    %16 = arith.addf %10, %15 : vector<8x128xf32>
    %17 = vector.extract_strided_slice %0 {offsets = [0, 2], sizes = [8, 1], strides = [1, 1]} : vector<8x4xf32> to vector<8x1xf32>
    %18 = vector.extract_strided_slice %1 {offsets = [2, 0], sizes = [1, 128], strides = [1, 1]} : vector<4x128xf32> to vector<1x128xf32>
    %19 = vector.broadcast %17 : vector<8x1xf32> to vector<8x128xf32>
    %20 = vector.broadcast %18 : vector<1x128xf32> to vector<8x128xf32>
    %21 = arith.mulf %19, %20 : vector<8x128xf32>
    %22 = arith.addf %16, %21 : vector<8x128xf32>
    %23 = vector.extract_strided_slice %0 {offsets = [0, 3], sizes = [8, 1], strides = [1, 1]} : vector<8x4xf32> to vector<8x1xf32>
    %24 = vector.extract_strided_slice %1 {offsets = [3, 0], sizes = [1, 128], strides = [1, 1]} : vector<4x128xf32> to vector<1x128xf32>
    %25 = vector.broadcast %23 : vector<8x1xf32> to vector<8x128xf32>
    %26 = vector.broadcast %24 : vector<1x128xf32> to vector<8x128xf32>
    %27 = arith.mulf %25, %26 : vector<8x128xf32>
    %28 = arith.addf %22, %27 : vector<8x128xf32>
    %cst = arith.constant 0.000000e+00 : f32
    %29 = vector.broadcast %cst : f32 to vector<8x128xf32>
    %30 = arith.maximumf %28, %29 : vector<8x128xf32>
    %c0_5 = arith.constant 0 : index
    %c0_6 = arith.constant 0 : index
    %31 = vector.load %arg4[%c0_5, %c0_6] : memref<128x128xf32, #tpu.memory_space<vmem>>, vector<128x128xf32>
    %cst_7 = arith.constant dense<0.000000e+00> : vector<8x128xf32>
    %32 = tpu.matmul %30, %31, %cst_7 {dimension_numbers = #tpu.dot_dimension_numbers<[1], [0], [0], [1], [0, 0, 1, 1], [], []>} : vector<8x128xf32>, vector<128x128xf32>, vector<8x128xf32> -> vector<8x128xf32>
    %c0_8 = arith.constant 0 : index
    %c0_9 = arith.constant 0 : index
    %33 = vector.load %arg5[%c0_8, %c0_9] : memref<1x128xf32, #tpu.memory_space<vmem>>, vector<1x128xf32>
    %34 = vector.broadcast %33 : vector<1x128xf32> to vector<8x128xf32>
    %35 = arith.addf %32, %34 : vector<8x128xf32>
    %c0_10 = arith.constant 0 : index
    %c0_11 = arith.constant 0 : index
    %36 = vector.load %arg6[%c0_10, %c0_11] : memref<8x128xf32, #tpu.memory_space<vmem>>, vector<8x128xf32>
    tpu.vector_store %arg6[%c0_10, %c0_11], %35 {strides = array<i32>} : memref<8x128xf32, #tpu.memory_space<vmem>>, vector<8x128xf32>,
    return
  }
  func.func @transform_0(%arg0: i32) -> (i32, i32) {
    %c0_i32 = arith.constant 0 : i32
    %c0_i32_0 = arith.constant 0 : i32
    return %arg0, %c0_i32 : i32, i32
  }
  func.func @transform_1(%arg0: i32) -> (i32, i32) {
    %c0_i32 = arith.constant 0 : i32
    %c0_i32_0 = arith.constant 0 : i32
    %c0_i32_1 = arith.constant 0 : i32
    return %c0_i32, %c0_i32_0 : i32, i32
  }
  func.func @transform_2(%arg0: i32) -> (i32, i32) {
    %c0_i32 = arith.constant 0 : i32
    %c0_i32_0 = arith.constant 0 : i32
    %c0_i32_1 = arith.constant 0 : i32
    return %c0_i32, %c0_i32_0 : i32, i32
  }
  func.func @transform_3(%arg0: i32) -> (i32, i32) {
    %c0_i32 = arith.constant 0 : i32
    %c0_i32_0 = arith.constant 0 : i32
    %c0_i32_1 = arith.constant 0 : i32
    return %c0_i32, %c0_i32_0 : i32, i32
  }
  func.func @transform_4(%arg0: i32) -> (i32, i32) {
    %c0_i32 = arith.constant 0 : i32
    %c0_i32_0 = arith.constant 0 : i32
    %c0_i32_1 = arith.constant 0 : i32
    return %c0_i32, %c0_i32_0 : i32, i32
  }
  func.func @transform_5(%arg0: i32) -> (i32, i32) {
    %c0_i32 = arith.constant 0 : i32
    %c0_i32_0 = arith.constant 0 : i32
    return %arg0, %c0_i32 : i32, i32
  }
}

</mosaic_0001>

<bundles_post_ra>
// kernel: neural_network_forward.1
= control target key start
LH: loop header
LB: loop body
LE: loop exit
PB: predicated region body
PF: predicated region fallthrough
CT: control target
= control target key end

     0   :  { %s420_s18 = smov 0   ;;  %s501_s0 = inlined_call_operand.vmem [shape: f32[24,4], index: 0, kind: input, shape index: {}]   ;;  %s502_s1 = inlined_call_operand.vmem [shape: f32[4,128], index: 1, kind: input, shape index: {}]   ;;  %s503_s2 = inlined_call_operand.vmem [shape: f32[1,128], index: 2, kind: input, shape index: {}]   ;;  %s504_s3 = inlined_call_operand.vmem [shape: f32[128,128], index: 3, kind: input, shape index: {}]   ;;  %s505_s4 = inlined_call_operand.vmem [shape: f32[1,128], index: 4, kind: input, shape index: {}]   ;;  %s506_s5 = inlined_call_operand.vmem [shape: f32[24,128], index: 5, kind: output, shape index: {}]  }
   0x1 LB: > { %s350_s19 = sadd.s32 4294967295, %s384_s18   ;;  %p354_p0 = scmp.ge.s32.totalorder %s384_s18, 1  ;;  %s384_s18 = sphi %s420_s18, %s15_s18  }
   0x2   : > { %p186_p1 = scmp.lt.s32.totalorder %s384_s18, 4 }
   0x4   : > { %p187_p2 = pnand %p354_p0, %p186_p1 }
   0x5   : > { %p212_p3 = scmp.lt.s32.totalorder (!%p187_p2), %s350_s19, 2 }
   0x6   : > { %190 = sbr.rel (%p187_p2) target bundleno = 278 (0x116), region = 40 }
   0xb   : > { %v271_v0 = vld [vmem:[%s504_s3 + $0x78] sm:$0xff]  ;;  %v386_v1 = vmov 0   ;;  %v387_v2 = vmov 2   ;;  %v270_v3 = vld [vmem:[%s504_s3 + $0x70] sm:$0xff]  ;;  %s508_s19 = smov (!%p212_p3, %s350_s19), 2  ;;  %v269_v4 = vld [vmem:[%s504_s3 + $0x68] sm:$0xff] }
   0xc   : > { %371 = vset.pattern.permute.xlu0 %v386_v1  ;;  %373 = vset.pattern.permute.xlu1 %v387_v2  ;;  %s355_s26 = sshll.u32 %s508_s19, 3  ;;  %v268_v5 = vld [vmem:[%s504_s3 + $0x60] sm:$0xff]  ;;  %v267_v7 = vld [vmem:[%s504_s3 + $0x58] sm:$0xff]  ;;  %v266_v8 = vld [vmem:[%s504_s3 + $0x50] sm:$0xff]  ;;  %v388_v9 = vmov 1   ;;  %v389_v10 = vmov 3  }
   0xd   : > { %276 = vmatpush.msra.mxu0 %v271_v0  ;;  %s215_s29 = scalar_lea.vmem %s501_s0, %s355_s26  ;;  %v265_v11 = vld [vmem:[%s504_s3 + $0x48] sm:$0xff]  ;;  %v264_v12 = vld [vmem:[%s504_s3 + $0x40] sm:$0xff]  ;;  %v263_v13 = vld [vmem:[%s504_s3 + $0x38] sm:$0xff]  ;;  %s219_s17 = scalar_lea.vmem %s506_s5, %s355_s26 }
   0xe   : > { %v220_v6 = vld [vmem:[%s215_s29] sm:$0xff]  ;;  %v262_v14 = vld [vmem:[%s504_s3 + $0x30] sm:$0xff]  ;;  %v261_v15 = vld [vmem:[%s504_s3 + $0x28] sm:$0xff] }
   0xf   : > { %277 = vmatpush.msra.mxu0 %v270_v3  ;;  %228 = vperm.xlu0 %371, %v220_v6   ;;  %v260_v16 = vld [vmem:[%s504_s3 + $0x20] sm:$0xff]  ;;  %v259_v17 = vld [vmem:[%s504_s3 + $0x18] sm:$0xff]  ;;  %v258_v18 = vld [vmem:[%s504_s3 + $0x10] sm:$0xff] }
  0x10   : > { %242 = vperm.xlu1 %373, %v220_v6   ;;  %v257_v19 = vld [vmem:[%s504_s3 + $0x8] sm:$0xff]  ;;  %v256_v20 = vld [vmem:[%s504_s3] sm:$0xff] }
  0x11   : > { %278 = vmatpush.msra.mxu0 %v269_v4  ;;  %v221_v21 = vld [vmem:[%s502_s1] sm:$0xf] }
  0x12   : > { %v231_v24 = vperm.slane %v221_v21, 0  ;;  %v376_v25 = vld [vmem:[%s503_s2] ss:$0 sm:$0xff]  ;;  %v238_v27 = vperm.slane %v221_v21, 1  ;;  %v245_v28 = vperm.slane %v221_v21, 2  ;;  %v252_v29 = vperm.slane %v221_v21, 3 }
  0x13   : > { %279 = vmatpush.msra.mxu0 %v268_v5  ;;  %v377_v40 = vld [vmem:[%s505_s4] ss:$0 sm:$0xff] }
  0x15   : > { %280 = vmatpush.msra.mxu0 %v267_v7 }
  0x17   : > { %281 = vmatpush.msra.mxu0 %v266_v8  ;;  %372 = vset.pattern.permute.xlu0 %v388_v9 }
  0x18   : > { %374 = vset.pattern.permute.xlu1 %v389_v10  ;;  %235 = vperm.xlu0 %372, %v220_v6  }
  0x19   : > { %249 = vperm.xlu1 %374, %v220_v6   ;;  %282 = vmatpush.msra.mxu0 %v265_v11 }
  0x1b   : > { %283 = vmatpush.msra.mxu0 %v264_v12 }
  0x1d   : > { %284 = vmatpush.msra.mxu0 %v263_v13 }
  0x1f   : > { %285 = vmatpush.msra.mxu0 %v262_v14 }
  0x20   : > { %375 = vset.pattern.permute.xlu0 %v389_v10 }
  0x21   : > { %286 = vmatpush.msra.mxu0 %v261_v15 }
  0x23   : > { %287 = vmatpush.msra.mxu0 %v260_v16 }
  0x25   : > { %288 = vmatpush.msra.mxu0 %v259_v17 }
  0x27   : > { %289 = vmatpush.msra.mxu0 %v258_v18 }
  0x29   : > { %290 = vmatpush.msra.mxu0 %v257_v19 }
  0x2b   : > { %291 = vmatpush.msra.mxu0 %v256_v20 }
  0x81   : > { %v229_v22 = vpop.permute.xlu0 %228 }
  0x82   : > { %v243_v23 = vpop.permute.xlu1 %242  ;;  %v232_v26 = vmul.f32 %v231_v24, %v229_v22 }
  0x83   : > { %v246_v34 = vmul.f32 %v245_v28, %v243_v23 }
  0x84   : > { %v233_v32 = vadd.f32 %v376_v25, %v232_v26 }
  0x8a   : > { %v236_v30 = vpop.permute.xlu0 %235 }
  0x8b   : > { %v250_v31 = vpop.permute.xlu1 %249  ;;  %v239_v33 = vmul.f32 %v238_v27, %v236_v30 }
  0x8c   : > { %v253_v36 = vmul.f32 %v252_v29, %v250_v31 }
  0x8d   : > { %v240_v35 = vadd.f32 %v239_v33, %v233_v32 }
  0x8f   : > { %v247_v37 = vadd.f32 %v246_v34, %v240_v35 }
  0x91   : > { %v254_v38 = vadd.f32 %v253_v36, %v247_v37 }
  0x93   : > { %v255_v39 = vmax.f32 %v254_v38, 0.0 }
  0x95   : > { %292 = vmatmul.f32.vlgmr.msra.gmra.mxu0 %v255_v39 }
 0x112   : > { %v293_v41 = vpop.f32.mrf.mxu0 }
 0x113   : > { %v294_v42 = vadd.f32 %v377_v40, %v293_v41 }
 0x115   : > { %296 = vst [vmem:[%s219_s17] sm:$0xff] %v294_v42 }
 0x116 PF: > { %s15_s18 = sadd.s32 1, %s384_s18  }
 0x117   : > { %p12_p4 = scmp.ge.s32.totalorder %s15_s18, 5  }
 0x119   :  { %14 = sbr.rel (!%p12_p4) target bundleno = 1 (0x1), region = 70 }

</bundles_post_ra>
